<compile_context>
chip_gen: v6e
topology: v6e:2x2x1
jax: 0.10.0
libtpu: 0.0.40
codegen_flags: <defaults>
</compile_context>

<pallas_src>
import jax
import jax.numpy as jnp
from jax.experimental import pallas as pl
from jax.experimental.pallas import tpu as pltpu


def mm_model_kernel(x_ref, w1_ref, b1_ref, w2_ref, b2_ref, o_ref):
    # css1: Linear(inputsize, 256) + ReLU  (BN/Dropout identity at eval).
    # bf16 operands on the MXU, f32 accumulation.
    h = jnp.dot(x_ref[...], w1_ref[...], preferred_element_type=jnp.float32)
    h = jnp.maximum(h + b1_ref[...], 0.0)
    # css4: Linear(256, 1) as elementwise multiply + lane reduce (VPU/XLU),
    # keeping the MXU free for the next tile's first-layer matmul.
    o = jnp.sum(h * w2_ref[...], axis=-1, keepdims=True)
    o_ref[...] = (o + b2_ref[0, 0]).astype(o_ref.dtype)


def mm_model(x, w1, b1, w2, b2, *, tile_b=512):
    B, K = x.shape
    H = w1.shape[1]
    assert w1.shape == (K, H) and w2.shape == (H, 1)

    # tile_b == B (full dim) or a multiple of 8 -> satisfies the (8,128) rule.
    tile_b = min(tile_b, B)
    grid = (pl.cdiv(B, tile_b),)

    # bf16 on the HBM stream / MXU; biases & second-layer weights stay f32.
    x_bf = x.astype(jnp.bfloat16)
    w1_bf = w1.astype(jnp.bfloat16)
    b1_f = b1.reshape(1, H).astype(jnp.float32)
    w2_row = w2.reshape(1, H).astype(jnp.float32)   # pre-transposed for lane reduce
    b2_s = b2.reshape(1, 1).astype(jnp.float32)

    # VMEM budget: double-buffered x/out tiles + resident weights, 2x headroom.
    vmem_est = (2 * tile_b * K * 2          # x tile (bf16), double-buffered
                + 2 * tile_b * 4            # out tile (f32), double-buffered
                + 2 * (K * H * 2 + H * 4 + H * 4))
    vmem_limit = int(min(max(2 * vmem_est, 32 * 1024 * 1024), 56 * 1024 * 1024))

    cost = pl.CostEstimate(
        flops=2 * B * K * H + 4 * B * H,
        transcendentals=0,
        bytes_accessed=(x_bf.size * 2 + w1_bf.size * 2
                        + (b1_f.size + w2_row.size + b2_s.size + B) * 4),
    )

    return pl.pallas_call(
        mm_model_kernel,
        out_shape=jax.ShapeDtypeStruct((B, 1), jnp.float32),
        grid=grid,
        in_specs=[
            pl.BlockSpec((tile_b, K), lambda i: (i, 0)),      # x: streamed per tile
            pl.BlockSpec((K, H), lambda i: (0, 0)),           # w1: grid-invariant resident
            pl.BlockSpec((1, H), lambda i: (0, 0)),           # b1: resident
            pl.BlockSpec((1, H), lambda i: (0, 0)),           # w2 (row): resident
            pl.BlockSpec((1, 1), lambda i: (0, 0),
                         memory_space=pltpu.MemorySpace.SMEM),  # b2 scalar
        ],
        out_specs=pl.BlockSpec((tile_b, 1), lambda i: (i, 0)),
        compiler_params=pltpu.CompilerParams(
            dimension_semantics=("parallel",),
            vmem_limit_bytes=vmem_limit,
        ),
        cost_estimate=cost,
    )(x_bf, w1_bf, b1_f, w2_row, b2_s)


def init_params(key, inputsize, hidden=256):
    k1, k2, k3, k4 = jax.random.split(key, 4)
    # deterministic, roughly Kaiming-scaled init
    w1 = jax.random.normal(k1, (inputsize, hidden), jnp.float32) * (2.0 / inputsize) ** 0.5
    b1 = jax.random.normal(k2, (1, hidden), jnp.float32) * 0.01
    w2 = jax.random.normal(k3, (hidden, 1), jnp.float32) * (2.0 / hidden) ** 0.5
    b2 = jax.random.normal(k4, (1, 1), jnp.float32) * 0.01
    return w1, b1, w2, b2


if __name__ == "__main__":
    key = jax.random.PRNGKey(0)
    kx, kp = jax.random.split(key)

    B, inputsize, hidden = 8, 32, 256   # small [batch, features] MLP input; css1 width is 256
    x = jax.random.normal(kx, (B, inputsize), jnp.float32)
    w1, b1, w2, b2 = init_params(kp, inputsize, hidden)

    out = jax.block_until_ready(mm_model(x, w1, b1, w2, b2))

    # Reference in plain JAX with the same bf16-operand / f32-accumulate math.
    h_ref = jnp.maximum(
        jnp.dot(x.astype(jnp.bfloat16), w1.astype(jnp.bfloat16),
                preferred_element_type=jnp.float32) + b1, 0.0)
    ref = jnp.sum(h_ref * w2.reshape(1, hidden), axis=-1, keepdims=True) + b2.reshape(1, 1)

    assert out.shape == (B, 1)
    assert jnp.allclose(out, ref, atol=1e-3, rtol=1e-3)

    print("KERNEL_OK")
</pallas_src>

<mosaic_0001>
module attributes {stable_mosaic.version = 11 : i64} {
  func.func @mm_model_kernel(%arg0: i32, %arg1: memref<8x32xbf16, #tpu.memory_space<vmem>>, %arg2: memref<32x256xbf16, #tpu.memory_space<vmem>>, %arg3: memref<1x256xf32, #tpu.memory_space<vmem>>, %arg4: memref<1x256xf32, #tpu.memory_space<vmem>>, %arg5: memref<1x1xf32, #tpu.memory_space<smem>>, %arg6: memref<8x1xf32, #tpu.memory_space<vmem>>) attributes {dimension_semantics = [#tpu.dimension_semantics<parallel>], iteration_bounds = array<i64: 1>, scalar_prefetch = 0 : i64, scratch_operands = 0 : i64, tpu.core_type = #tpu.core_type<tc>, window_params = [{transform_indices = @transform_0, window_bounds = array<i64: 8, 32>}, {pipeline_mode = #tpu.pipeline_mode<synchronous>, transform_indices = @transform_1, window_bounds = array<i64: 32, 256>}, {pipeline_mode = #tpu.pipeline_mode<synchronous>, transform_indices = @transform_2, window_bounds = array<i64: 1, 256>}, {pipeline_mode = #tpu.pipeline_mode<synchronous>, transform_indices = @transform_3, window_bounds = array<i64: 1, 256>}, {transform_indices = @transform_4, window_bounds = array<i64: 1, 1>}, {transform_indices = @transform_5, window_bounds = array<i64: 8, 1>}]} {
    %c0 = arith.constant 0 : index
    %c0_0 = arith.constant 0 : index
    %0 = vector.load %arg1[%c0, %c0_0] : memref<8x32xbf16, #tpu.memory_space<vmem>>, vector<8x32xbf16>
    %c0_1 = arith.constant 0 : index
    %c0_2 = arith.constant 0 : index
    %1 = vector.load %arg2[%c0_1, %c0_2] : memref<32x256xbf16, #tpu.memory_space<vmem>>, vector<32x256xbf16>
    %cst = arith.constant dense<0.000000e+00> : vector<8x256xf32>
    %2 = tpu.matmul %0, %1, %cst {dimension_numbers = #tpu.dot_dimension_numbers<[1], [0], [0], [1], [0, 0, 1, 1], [], []>} : vector<8x32xbf16>, vector<32x256xbf16>, vector<8x256xf32> -> vector<8x256xf32>
    %c0_3 = arith.constant 0 : index
    %c0_4 = arith.constant 0 : index
    %3 = vector.load %arg3[%c0_3, %c0_4] : memref<1x256xf32, #tpu.memory_space<vmem>>, vector<1x256xf32>
    %4 = vector.broadcast %3 : vector<1x256xf32> to vector<8x256xf32>
    %5 = arith.addf %2, %4 : vector<8x256xf32>
    %cst_5 = arith.constant 0.000000e+00 : f32
    %6 = vector.broadcast %cst_5 : f32 to vector<8x256xf32>
    %7 = arith.maximumf %5, %6 : vector<8x256xf32>
    %c0_6 = arith.constant 0 : index
    %c0_7 = arith.constant 0 : index
    %8 = vector.load %arg4[%c0_6, %c0_7] : memref<1x256xf32, #tpu.memory_space<vmem>>, vector<1x256xf32>
    %9 = vector.broadcast %8 : vector<1x256xf32> to vector<8x256xf32>
    %10 = arith.mulf %7, %9 : vector<8x256xf32>
    %cst_8 = arith.constant dense<0.000000e+00> : vector<8xf32>
    %11 = vector.multi_reduction <add>, %10, %cst_8 [1] : vector<8x256xf32> to vector<8xf32>
    %12 = vector.shape_cast %11 : vector<8xf32> to vector<8x1xf32>
    %c0_9 = arith.constant 0 : index
    %c0_10 = arith.constant 0 : index
    %13 = memref.load %arg5[%c0_9, %c0_10] : memref<1x1xf32, #tpu.memory_space<smem>>
    %14 = vector.broadcast %13 : f32 to vector<8x1xf32>
    %15 = arith.addf %12, %14 : vector<8x1xf32>
    %c0_11 = arith.constant 0 : index
    %c0_12 = arith.constant 0 : index
    %16 = vector.load %arg6[%c0_11, %c0_12] : memref<8x1xf32, #tpu.memory_space<vmem>>, vector<8x1xf32>
    tpu.vector_store %arg6[%c0_11, %c0_12], %15 {strides = array<i32>} : memref<8x1xf32, #tpu.memory_space<vmem>>, vector<8x1xf32>,
    return
  }
  func.func @transform_0(%arg0: i32) -> (i32, i32) {
    %c0_i32 = arith.constant 0 : i32
    %c0_i32_0 = arith.constant 0 : i32
    return %arg0, %c0_i32 : i32, i32
  }
  func.func @transform_1(%arg0: i32) -> (i32, i32) {
    %c0_i32 = arith.constant 0 : i32
    %c0_i32_0 = arith.constant 0 : i32
    %c0_i32_1 = arith.constant 0 : i32
    return %c0_i32, %c0_i32_0 : i32, i32
  }
  func.func @transform_2(%arg0: i32) -> (i32, i32) {
    %c0_i32 = arith.constant 0 : i32
    %c0_i32_0 = arith.constant 0 : i32
    %c0_i32_1 = arith.constant 0 : i32
    return %c0_i32, %c0_i32_0 : i32, i32
  }
  func.func @transform_3(%arg0: i32) -> (i32, i32) {
    %c0_i32 = arith.constant 0 : i32
    %c0_i32_0 = arith.constant 0 : i32
    %c0_i32_1 = arith.constant 0 : i32
    return %c0_i32, %c0_i32_0 : i32, i32
  }
  func.func @transform_4(%arg0: i32) -> (i32, i32) {
    %c0_i32 = arith.constant 0 : i32
    %c0_i32_0 = arith.constant 0 : i32
    %c0_i32_1 = arith.constant 0 : i32
    return %c0_i32, %c0_i32_0 : i32, i32
  }
  func.func @transform_5(%arg0: i32) -> (i32, i32) {
    %c0_i32 = arith.constant 0 : i32
    %c0_i32_0 = arith.constant 0 : i32
    return %arg0, %c0_i32 : i32, i32
  }
}

</mosaic_0001>

<bundles_post_ra>
// kernel: tpu_custom_call.1
= control target key start
LH: loop header
LB: loop body
LE: loop exit
PB: predicated region body
PF: predicated region fallthrough
CT: control target
= control target key end

     0   :  { %11 = vsyncpa [#allocation4], 0  ;;  %s273_s0 = inlined_call_operand.hbm [shape: bf16[8,32], index: 0, kind: input, shape index: {}]   ;;  %s274_s1 = inlined_call_operand.hbm [shape: bf16[32,256], index: 1, kind: input, shape index: {}]   ;;  %s275_s2 = inlined_call_operand.vmem [shape: f32[1,256], index: 2, kind: input, shape index: {}]   ;;  %s276_s3 = inlined_call_operand.vmem [shape: f32[1,256], index: 3, kind: input, shape index: {}]   ;;  %s277_s4 = inlined_call_operand.<no memory space> [shape: f32[1,1], index: 4, kind: input, shape index: {}]   ;;  %s278_s5 = inlined_call_operand.vmem [shape: f32[8,1], index: 5, kind: output, shape index: {}]  }
   0x1   :  { %12 = vsyncpa [#allocation6], 0  ;;  %s220_s18 = smov [#allocation3]   ;;  %s221_s20 = smov [#allocation5]  }
   0x2   :  { %s19_s19 = sshll.u32 %s220_s18, 4  ;;  %s28_s21 = sshll.u32 %s221_s20, 4  ;;  %s20_s19 = int_to_ptr.vmem [resolvable:$true] %s19_s19  ;;  %s29_s21 = int_to_ptr.vmem [resolvable:$true] %s28_s21 }
   0x3   :  { %s184_s22 = scalar_lea.vmem %s20_s19, 64  ;;  %p189_p1 = scmp.lt.s32.totalorder %s20_s19, %s20_s19 }
   0x4   :  { %p185_p0 = scmp.ne.s32.totalorder %s20_s19, %s184_s22  ;;  %p190_p2 = scmp.lt.s32.totalorder %s184_s22, %s184_s22 }
   0x6   :  { %p191_p3 = por %p190_p2, %p189_p1 }
   0x8   :  { %p192_p4 = pnand %p191_p3, %p185_p0 }
   0xa   :  { %195 = shalt.err (!%p192_p4)
}
   0xb   :  { %22 = dma.hbm_to_vmem [thread:$0]  %s273_s0, 64, %s20_s19, [#allocation4]  }
   0xc   :  { %s204_s25 = scalar_lea.vmem %s29_s21, 512  ;;  %p209_p6 = scmp.lt.s32.totalorder %s29_s21, %s29_s21 }
   0xd   :  { %p205_p5 = scmp.ne.s32.totalorder %s29_s21, %s204_s25  ;;  %p210_p7 = scmp.lt.s32.totalorder %s204_s25, %s204_s25 }
   0xf   :  { %p211_p8 = por %p210_p7, %p209_p6 }
  0x11   :  { %p212_p9 = pnand %p211_p8, %p205_p5 }
  0x13   :  { %215 = shalt.err (!%p212_p9)
}
  0x14   :  { %s222_s26 = smov 128   ;;  %s223_s27 = smov 8  }
  0x15   :  { %34 = dma.hbm_to_vmem [thread:$0]  %s274_s1, 512, %s29_s21, [#allocation6], %s222_s26, %s222_s26, %s223_s27  }
  0x16   :  { %216 = dma.done.wait [#allocation4], 64  }
  0x17   :  { %217 = vsyncadd [#allocation4], 4294967232 }
  0x18   :  { %218 = dma.done.wait [#allocation6], 512  }
  0x19   :  { %219 = vsyncadd [#allocation6], 4294966784  ;;  %v224_v0 = vmov 0   ;;  %v170_v1 = vld [vmem:[#allocation5 + $0x14] ss:$8 sps:$4 sm:$0xff]   ;;  %vm85_vm0 = vcmask 261120   ;;  %v55_v6 = vlaneseq  ;;  %v150_v27 = vstv %s277_s4 }
  0x1a   :  { %121 = vmatprep.mubr.bf16.mxu0 %v224_v0  ;;  %v172_v2 = vld [vmem:[#allocation5 + $0x10] ss:$8 sps:$4 sm:$0xff]   ;;  %101 = vmatprep.subr.bf16.mxu0 %v170_v1  ;;  %v173_v3 = vld [vmem:[#allocation5 + $0x4] ss:$8 sps:$4 sm:$0xff]   ;;  %v175_v4 = vld [vmem:[#allocation5] ss:$8 sps:$4 sm:$0xff]  }
  0x1b   :  { %102 = vmatpush1.bf16.msra.mxu0 %v172_v2  ;;  %v48_v5 = vld [vmem:[#allocation3] sm:$0xf]  ;;  %v56_v7 = vshrl.u32 %v55_v6, 7  ;;  %vm152_vm1 = vcmask 7168  }
  0x1c   :  { %103 = vmatprep.subr.bf16.mxu0 %v173_v3  ;;  %v53_v9 = vld [vmem:[%s275_s2] sm:$0x3] }
  0x1d   :  { %v57_v8 = vsub.s32 0, %v56_v7  ;;  %v61_v10 = vsub.s32 1, %v56_v7  ;;  %v132_v14 = vld [vmem:[%s276_s3] sm:$0x3] }
  0x1f   :  { %104 = vmatpush1.bf16.msra.mxu0 %v175_v4  ;;  %v58_v11 = vrot.slane %v53_v9, %v57_v8  ;;  %v62_v12 = vrot.slane %v53_v9, %v61_v10  ;;  %v137_v19 = vrot.slane %v132_v14, %v57_v8  ;;  %v141_v20 = vrot.slane %v132_v14, %v61_v10 }
  0x22   :  { %164 = vmatmul.mubr.msk.bf16.vlgmr.msra.gmra.mxu0 %vm85_vm0, %v48_v5 }
  0xe2   :  { %v123_v13 = vpop.f32.mrf.mxu0 }
  0xe3   :  { %v124_v15 = vadd.f32 %v123_v13, %v58_v11 }
  0xe4   :  { %v125_v16 = vpop.f32.mrf.mxu0 }
  0xe5   :  { %v130_v17 = vmax.f32 %v124_v15, 0.0  ;;  %v126_v18 = vadd.f32 %v125_v16, %v62_v12 }
  0xe6   :  { %v127_v21 = vpop.f32.mrf.mxu0 }
  0xe7   :  { %v131_v22 = vmax.f32 %v126_v18, 0.0  ;;  %v144_v24 = vmul.f32 %v137_v19, %v130_v17 }
  0xe8   :  { %v128_v23 = vpop.f32.mrf.mxu0 }
  0xe9   :  { %v145_v25 = vmul.f32 %v141_v20, %v131_v22 }
  0xeb   :  { %v146_v26 = vadd.f32 %v145_v25, %v144_v24 }
  0xed   :  { %147 = vadd.xlane.f32.xlu0 %v146_v26 }
 0x176   :  { %v148_v28 = vpop.xlane.xlu0 %147 }
 0x177   :  { %v151_v29 = vadd.f32 %v150_v27, %v148_v28 }
 0x179   :  { %153 = vst.msk [vmem:[%s278_s5] sm:$0xff] %vm152_vm1, %v151_v29 }
 0x17a   :  { %158 = vsyncpa [#allocation4], 1 }
 0x17b   :  { %159 = vsyncpa [#allocation6], 1 }

</bundles_post_ra>
